<compile_context>
chip_gen: v7x
topology: tpu7x:2x2x1
jax: 0.10.0
libtpu: 0.0.40
codegen_flags: <defaults>
</compile_context>

<pallas_src>
import jax
import jax.numpy as jnp
from jax import lax
from jax.experimental import pallas as pl
from jax.experimental.pallas import tpu as pltpu

KERNEL = 3
STRIDE = 3  # MaxPool2d default stride == kernel_size

_VMEM_BUDGET = 24 * 1024 * 1024   # target bytes for kernel buffers
_VMEM_LIMIT = 48 * 1024 * 1024    # scoped VMEM limit (safe on v5e/v6e/v7x)


def _round_up(a, b):
    return (a + b - 1) // b * b


def _min_value(dtype):
    dtype = jnp.dtype(dtype)
    if jnp.issubdtype(dtype, jnp.floating):
        return float("-inf")
    if jnp.issubdtype(dtype, jnp.integer):
        return int(jnp.iinfo(dtype).min)
    if dtype == jnp.bool_:
        return False
    raise ValueError(f"maxpool2d_ceil: unsupported dtype {dtype}")


def maxpool2d_ceil(x):
    """MaxPool2d(kernel_size=3, stride=3, padding=0, ceil_mode=True) on NCHW."""
    N, C, H, W = x.shape
    k, s = KERNEL, STRIDE
    # ceil_mode output size (padding=0): ceil((H - k) / s) + 1
    Ho = -(-(H - k) // s) + 1
    Wo = -(-(W - k) // s) + 1
    Hp = (Ho - 1) * s + k          # padded extents (exact multiples of 3)
    Wp = (Wo - 1) * s + k
    NC = N * C
    dtype = x.dtype
    isz = jnp.dtype(dtype).itemsize
    neg = _min_value(dtype)
    needs_pad = (Hp > H) or (Wp > W)

    # ---- choose TB = number of (n, c) slices per grid step -------------------
    def vmem_bytes(tb):
        if needs_pad:
            inp = 2 * tb * _round_up(H, 8) * _round_up(W, 128) * isz
            pad = _round_up(tb * Hp, 8) * _round_up(Wp, 128) * isz
        else:
            inp = 2 * _round_up(tb * H, 8) * _round_up(W, 128) * isz
            pad = 0
        out = 2 * _round_up(tb * Ho, 8) * _round_up(Wo, 128) * isz
        col = _round_up(Wp, 8) * _round_up(tb * Ho, 128) * isz
        return inp + pad + out + col

    max_tb = -(-NC // 2) if NC >= 2 else 1   # keep >= 2 grid steps (v7x: 2 TCs)
    TB = 1
    for d in range(1, NC + 1):               # largest divisor of NC that fits
        if NC % d == 0 and d <= max_tb and vmem_bytes(d) <= _VMEM_BUDGET:
            TB = d
    G = NC // TB
    # TODO(synk): for very large single slices (H*W*itemsize >~ VMEM budget) add
    # an extra grid axis over row groups of 3; not needed at these sizes.

    # ---- kernel ---------------------------------------------------------------
    def kernel(x_ref, o_ref, *scratch):
        if needs_pad:
            pad_ref, col_ref = scratch
            # Emulate the ceil_mode padding in VMEM (never touches HBM).
            pad_ref[...] = jnp.full((TB * Hp, Wp), neg, dtype)

            def copy_slice(b, carry):
                pad_ref[pl.ds(b * Hp, H), :W] = x_ref[b]
                return carry

            lax.fori_loop(0, TB, copy_slice, 0)
            src = pad_ref                      # (TB*Hp, Wp)
        else:
            (col_ref,) = scratch
            src = x_ref                        # (TB*Hp, Wp) == (TB*H, W)

        # Row reduce: rows kh, kh+3, ... (sublane-strided loads; Hp % 3 == 0 so
        # the stride-3 pattern tiles cleanly across the TB batched slices).
        m = src[pl.ds(0, TB * Ho, stride=3), :]
        m = jnp.maximum(m, src[pl.ds(1, TB * Ho, stride=3), :])
        m = jnp.maximum(m, src[pl.ds(2, TB * Ho, stride=3), :])   # (TB*Ho, Wp)

        # Bring W onto the sublane axis and reduce columns the same way.
        col_ref[...] = m.T                                        # (Wp, TB*Ho)
        r = col_ref[pl.ds(0, Wo, stride=3), :]
        r = jnp.maximum(r, col_ref[pl.ds(1, Wo, stride=3), :])
        r = jnp.maximum(r, col_ref[pl.ds(2, Wo, stride=3), :])    # (Wo, TB*Ho)

        o_ref[...] = r.T                                          # (TB*Ho, Wo)

    # ---- specs ----------------------------------------------------------------
    if needs_pad:
        in_arr = x.reshape(NC, H, W)                          # free reshape
        in_spec = pl.BlockSpec((TB, H, W), lambda i: (i, 0, 0))
        scratch_shapes = [pltpu.VMEM((TB * Hp, Wp), dtype),
                          pltpu.VMEM((Wp, TB * Ho), dtype)]
    else:
        in_arr = x.reshape(G, TB * H, W)                      # free reshape
        in_spec = pl.BlockSpec((None, TB * H, W), lambda i: (i, 0, 0))
        scratch_shapes = [pltpu.VMEM((Wp, TB * Ho), dtype)]

    out = pl.pallas_call(
        kernel,
        out_shape=jax.ShapeDtypeStruct((G, TB * Ho, Wo), dtype),
        grid=(G,),
        in_specs=[in_spec],
        out_specs=pl.BlockSpec((None, TB * Ho, Wo), lambda i: (i, 0, 0)),
        scratch_shapes=scratch_shapes,
        compiler_params=pltpu.CompilerParams(
            dimension_semantics=("parallel",),
            vmem_limit_bytes=_VMEM_LIMIT),
    )(in_arr)

    return out.reshape(N, C, Ho, Wo)   # free reshape (row-major compatible)


def _reference(x):
    N, C, H, W = x.shape
    Ho = -(-(H - KERNEL) // STRIDE) + 1
    Wo = -(-(W - KERNEL) // STRIDE) + 1
    Hp = (Ho - 1) * STRIDE + KERNEL
    Wp = (Wo - 1) * STRIDE + KERNEL
    xp = jnp.pad(x, ((0, 0), (0, 0), (0, Hp - H), (0, Wp - W)),
                 constant_values=-jnp.inf)
    return lax.reduce_window(xp, -jnp.inf, lax.max,
                             (1, 1, KERNEL, KERNEL),
                             (1, 1, STRIDE, STRIDE), "VALID")


if __name__ == "__main__":
    key = jax.random.PRNGKey(0)

    # Case 1: ceil_mode actually pads (16 not divisible by 3).
    x1 = jax.random.normal(key, (2, 4, 16, 16), dtype=jnp.float32)
    y1 = jax.block_until_ready(maxpool2d_ceil(x1))
    assert y1.shape == (2, 4, 6, 6), y1.shape
    assert jnp.allclose(y1, _reference(x1)), "mismatch vs reference (padded case)"

    # Case 2: spatial dims divisible by 3 (no-padding fast path).
    x2 = jax.random.normal(jax.random.PRNGKey(1), (1, 3, 12, 12), dtype=jnp.float32)
    y2 = jax.block_until_ready(maxpool2d_ceil(x2))
    assert y2.shape == (1, 3, 4, 4), y2.shape
    assert jnp.allclose(y2, _reference(x2)), "mismatch vs reference (exact case)"

    print("KERNEL_OK")
</pallas_src>

<mosaic_0001>
module attributes {stable_mosaic.version = 11 : i64} {
  func.func @kernel(%arg0: i32, %arg1: memref<4x16x16xf32, #tpu.memory_space<vmem>>, %arg2: memref<1x24x6xf32, #tpu.memory_space<vmem>>, %arg3: memref<72x18xf32, #tpu.memory_space<vmem>>, %arg4: memref<18x24xf32, #tpu.memory_space<vmem>>) attributes {dimension_semantics = [#tpu.dimension_semantics<parallel>], iteration_bounds = array<i64: 2>, scalar_prefetch = 0 : i64, scratch_operands = 2 : i64, tpu.core_type = #tpu.core_type<tc>, window_params = [{transform_indices = @transform_0, window_bounds = array<i64: 4, 16, 16>}, {transform_indices = @transform_1, window_bounds = array<i64: 1, 24, 6>}]} {
    %cst = arith.constant 0xFF800000 : f32
    %0 = vector.broadcast %cst : f32 to vector<72x18xf32>
    %c0 = arith.constant 0 : index
    %c0_0 = arith.constant 0 : index
    %1 = vector.load %arg3[%c0, %c0_0] : memref<72x18xf32, #tpu.memory_space<vmem>>, vector<72x18xf32>
    tpu.vector_store %arg3[%c0, %c0_0], %0 {strides = array<i32>} : memref<72x18xf32, #tpu.memory_space<vmem>>, vector<72x18xf32>,
    %c0_i32 = arith.constant 0 : i32
    %c4_i32 = arith.constant 4 : i32
    %2 = arith.addi %c0_i32, %c4_i32 : i32
    %c1_i32 = arith.constant 1 : i32
    scf.for %arg5 = %c0_i32 to %2 step %c1_i32  : i32 {
      %19 = arith.index_cast %arg5 : i32 to index
      %c0_17 = arith.constant 0 : index
      %c0_18 = arith.constant 0 : index
      %20 = vector.load %arg1[%19, %c0_17, %c0_18] : memref<4x16x16xf32, #tpu.memory_space<vmem>>, vector<1x16x16xf32>
      %21 = vector.shape_cast %20 : vector<1x16x16xf32> to vector<16x16xf32>
      %c18_i32 = arith.constant 18 : i32
      %22 = arith.muli %arg5, %c18_i32 : i32
      %23 = arith.index_cast %22 : i32 to index
      %c0_19 = arith.constant 0 : index
      %24 = vector.load %arg3[%23, %c0_19] : memref<72x18xf32, #tpu.memory_space<vmem>>, vector<16x16xf32>
      tpu.vector_store %arg3[%23, %c0_19], %21 {strides = array<i32>} : memref<72x18xf32, #tpu.memory_space<vmem>>, vector<16x16xf32>,
    }
    %c4_i32_1 = arith.constant 4 : i32
    %c0_2 = arith.constant 0 : index
    %c0_3 = arith.constant 0 : index
    %3 = tpu.strided_load %arg3[%c0_2, %c0_3] {strides = array<i32: 3, 1>} : memref<72x18xf32, #tpu.memory_space<vmem>>, vector<24x18xf32>
    %c1 = arith.constant 1 : index
    %c0_4 = arith.constant 0 : index
    %4 = tpu.strided_load %arg3[%c1, %c0_4] {strides = array<i32: 3, 1>} : memref<72x18xf32, #tpu.memory_space<vmem>>, vector<24x18xf32>
    %5 = arith.maximumf %3, %4 : vector<24x18xf32>
    %c2 = arith.constant 2 : index
    %c0_5 = arith.constant 0 : index
    %6 = tpu.strided_load %arg3[%c2, %c0_5] {strides = array<i32: 3, 1>} : memref<72x18xf32, #tpu.memory_space<vmem>>, vector<24x18xf32>
    %7 = arith.maximumf %5, %6 : vector<24x18xf32>
    %8 = tpu.transpose %7, [1, 0] : vector<24x18xf32> -> vector<18x24xf32>
    %c0_6 = arith.constant 0 : index
    %c0_7 = arith.constant 0 : index
    %9 = vector.load %arg4[%c0_6, %c0_7] : memref<18x24xf32, #tpu.memory_space<vmem>>, vector<18x24xf32>
    tpu.vector_store %arg4[%c0_6, %c0_7], %8 {strides = array<i32>} : memref<18x24xf32, #tpu.memory_space<vmem>>, vector<18x24xf32>,
    %c0_8 = arith.constant 0 : index
    %c0_9 = arith.constant 0 : index
    %10 = tpu.strided_load %arg4[%c0_8, %c0_9] {strides = array<i32: 3, 1>} : memref<18x24xf32, #tpu.memory_space<vmem>>, vector<6x24xf32>
    %c1_10 = arith.constant 1 : index
    %c0_11 = arith.constant 0 : index
    %11 = tpu.strided_load %arg4[%c1_10, %c0_11] {strides = array<i32: 3, 1>} : memref<18x24xf32, #tpu.memory_space<vmem>>, vector<6x24xf32>
    %12 = arith.maximumf %10, %11 : vector<6x24xf32>
    %c2_12 = arith.constant 2 : index
    %c0_13 = arith.constant 0 : index
    %13 = tpu.strided_load %arg4[%c2_12, %c0_13] {strides = array<i32: 3, 1>} : memref<18x24xf32, #tpu.memory_space<vmem>>, vector<6x24xf32>
    %14 = arith.maximumf %12, %13 : vector<6x24xf32>
    %15 = tpu.transpose %14, [1, 0] : vector<6x24xf32> -> vector<24x6xf32>
    %c0_14 = arith.constant 0 : index
    %c0_15 = arith.constant 0 : index
    %c0_16 = arith.constant 0 : index
    %16 = vector.load %arg2[%c0_14, %c0_15, %c0_16] : memref<1x24x6xf32, #tpu.memory_space<vmem>>, vector<1x24x6xf32>
    %17 = vector.shape_cast %16 : vector<1x24x6xf32> to vector<24x6xf32>
    %18 = vector.shape_cast %15 : vector<24x6xf32> to vector<1x24x6xf32>
    tpu.vector_store %arg2[%c0_14, %c0_15, %c0_16], %18 {strides = array<i32>} : memref<1x24x6xf32, #tpu.memory_space<vmem>>, vector<1x24x6xf32>,
    return
  }
  func.func @transform_0(%arg0: i32) -> (i32, i32, i32) {
    %c0_i32 = arith.constant 0 : i32
    %c0_i32_0 = arith.constant 0 : i32
    %c0_i32_1 = arith.constant 0 : i32
    return %arg0, %c0_i32, %c0_i32_0 : i32, i32, i32
  }
  func.func @transform_1(%arg0: i32) -> (i32, i32, i32) {
    %c0_i32 = arith.constant 0 : i32
    %c0_i32_0 = arith.constant 0 : i32
    %c0_i32_1 = arith.constant 0 : i32
    return %arg0, %c0_i32, %c0_i32_0 : i32, i32, i32
  }
}

</mosaic_0001>

<bundles_post_ra>
// kernel: tpu_custom_call.1
= control target key start
LH: loop header
LB: loop body
LE: loop exit
PB: predicated region body
PF: predicated region fallthrough
CT: control target
= control target key end

     0   :  { %6 = vsyncpa [#allocation5], 0  ;;  %s616_s0 = inlined_call_operand.hbm [shape: f32[8,16,16], index: 0, kind: input, shape index: {}]   ;;  %s617_s1 = inlined_call_operand.vmem [shape: f32[2,24,6], index: 1, kind: output, shape index: {}]  }
   0x1   :  { %8 = vsyncpa [#allocation5 + $0x1], 0  ;;  %s498_s6 = smov 0   ;;  %s500_s7 = smov 0  }
   0x2   :  { %s502_s8 = smov 0   ;;  %s504_s9 = smov 0  }
   0x3 LB: > { %s517_s10 = sadd.s32 4294967295, %s478_s9   ;;  %s520_s11 = sadd.s32 1, %s478_s9   ;;  %s478_s9 = sphi %s504_s9, %s624_s9   ;;  %s474_s8 = sphi %s502_s8, %s623_s8   ;;  %s470_s7 = sphi %s500_s7, %s622_s7   ;;  %s466_s6 = sphi %s498_s6, %s621_s6  }
   0x4   : > { %s18_s12 = ssub.s32 %s478_s9, %s520_s11  ;;  %s21_s13 = sadd.s32 1, %s474_s8 }
   0x5   : > { %p19_p0 = scmp.eq.s32.totalorder %s18_s12, 0  ;;  %p28_p1 = scmp.ne.s32.totalorder %s474_s8, %s470_s7 }
   0x6   : > { %p29_p2 = scmp.eq.s32.totalorder %s478_s9, 0  ;;  %p34_p3 = scmp.ne.s32.totalorder %s470_s7, %s466_s6 }
   0x7   : > { %s530_s14 = scalar_select %p19_p0, %s474_s8, %s21_s13  }
   0x8   : > { %p30_p4 = por %p29_p2, %p28_p1  ;;  %p35_p5 = scmp.eq.s32.totalorder %s517_s10, 0 }
   0x9   : > { %p365_p6 = scmp.lt.s32.totalorder %s478_s9, 2  ;;  %s84_s16 = sand.u32 1, %s474_s8  }
   0xa   : > { %p534_p7 = por %p35_p5, %p34_p3  ;;  %s346_s17 = sshll.u32 %s84_s16, 6 }
   0xb   : > { %s357_s18 = sshll.u32 %s478_s9, 10  ;;  %s88_s22 = scalar_lea.vmem [#allocation4], %s346_s17 }
   0xc   : > { %s543_s21 = scalar_lea.hbm %s616_s0, %s357_s18  ;;  %s96_s23 = sshll.u32 %s88_s22, 4  ;;  %s545_s23 = int_to_ptr.vmem [resolvable:$true] %s96_s23 }
   0xd   : > { %p547_p8 = pnand %p365_p6, %p30_p4  ;;  %s552_s25 = scalar_lea.sflag [#allocation5], %s84_s16 }
   0xe   : > { %s410_s26 = scalar_lea.hbm %s543_s21, 1024  ;;  %s415_s29 = scalar_lea.hbm %s616_s0, 2048 }
   0xf   : > { %p411_p10 = scmp.ne.s32.totalorder %s543_s21, %s410_s26  ;;  %p412_p11 = pneg %p547_p8 }
  0x10   : > { %p416_p0 = scmp.lt.u32.totalorder %s543_s21, %s616_s0  ;;  %p417_p1 = scmp.lt.u32.totalorder %s415_s29, %s410_s26 }
  0x11   : > { %p413_p12 = pnand %p412_p11, %p411_p10  ;;  %p419_p3 = scmp.lt.u32.totalorder %s410_s26, %s543_s21 }
  0x12   : > { %p418_p2 = por %p417_p1, %p416_p0 }
  0x13   : > { %p414_p13 = pneg %p413_p12 }
  0x14   : > { %p420_p4 = por %p419_p3, %p418_p2 }
  0x16   : > { %p421_p5 = pnand %p420_p4, %p414_p13 }
  0x18   : > { %424 = shalt.err (!%p421_p5)
}
  0x19   : > { %s425_s3 = scalar_lea.vmem %s545_s23, 1024  ;;  %s484_s4 = smov [#allocation4]  }
  0x1a   : > { %p426_p6 = scmp.ne.s32.totalorder %s545_s23, %s425_s3  ;;  %s430_s5 = sshll.u32 %s484_s4, 4  ;;  %s431_s5 = int_to_ptr.vmem [resolvable:$false] %s430_s5 }
  0x1b   : > { %s432_s6 = scalar_lea.vmem %s431_s5, 2048  ;;  %p433_p9 = scmp.lt.s32.totalorder %s545_s23, %s431_s5 }
  0x1c   : > { %p428_p10 = pnand %p426_p6, %p412_p11  ;;  %p434_p0 = scmp.lt.s32.totalorder %s432_s6, %s425_s3 }
  0x1e   : > { %p429_p12 = pneg %p428_p10  ;;  %p435_p1 = por %p434_p0, %p433_p9 }
  0x20   : > { %p436_p2 = pnand %p435_p1, %p429_p12 }
  0x22   : > { %439 = shalt.err (!%p436_p2)
}
  0x23   : > { %s485_s12 = smov 128   ;;  %s486_s13 = smov 8  }
  0x24   : > { %364 = dma.hbm_to_vmem [thread:$0]  (!%p547_p8), %s543_s21, 1024, %s545_s23, %s552_s25, %s485_s12, %s485_s12, %s486_s13  }
  0x25   : > { %p104_p11 = scmp.lt.s32.totalorder %s478_s9, 3  ;;  %p620_p13 = scmp.ge.s32.totalorder %s478_s9, 1 }
  0x27   : > { %p105_p3 = pnand %p620_p13, %p104_p11 }
  0x28   : > { %s110_s16 = sand.u32 (!%p105_p3), 1, %s470_s7  }
  0x29   : > { %108 = sbr.rel (%p105_p3) target bundleno = 357 (0x165), region = 24  ;;  %s584_s17 = sshll.u32 (!%p105_p3), %s110_s16, 6 }
  0x2a   : > { %s111_s18 = scalar_lea.sflag (!%p105_p3), [#allocation5], %s110_s16  ;;  %s114_s19 = scalar_lea.vmem (!%p105_p3), [#allocation4], %s584_s17 }
  0x30   : > { %461 = dma.done.wait (%p534_p7), %s111_s18, 1024  }
  0x31   : > { %463 = vsyncadd (%p534_p7), %s111_s18, 4294966272  ;;  %p134_p8 = scmp.lt.s32.totalorder %s517_s10, 1  ;;  %vm139_vm0 = vcmask 146432   ;;  %v487_v0 = vmov -inf   ;;  %s480_s22 = smov 0  }
  0x32   : > { %140 = vst.msk [vmem:[#allocation2] sm:$0xff] %vm139_vm0, %v487_v0  ;;  %141 = vst.msk [vmem:[#allocation2 + $0x8] sm:$0xff] %vm139_vm0, %v487_v0 }
  0x33   : > { %142 = vst.msk [vmem:[#allocation2 + $0x10] sm:$0xff] %vm139_vm0, %v487_v0  ;;  %143 = vst.msk [vmem:[#allocation2 + $0x18] sm:$0xff] %vm139_vm0, %v487_v0  ;;  %s626_s10 = smov (!%p134_p8, %s517_s10), 1 }
  0x34   : > { %144 = vst.msk [vmem:[#allocation2 + $0x20] sm:$0xff] %vm139_vm0, %v487_v0  ;;  %145 = vst.msk [vmem:[#allocation2 + $0x28] sm:$0xff] %vm139_vm0, %v487_v0  ;;  %s358_s9 = smul.u32 24, %s626_s10 }
  0x35   : > { %146 = vst.msk [vmem:[#allocation2 + $0x30] sm:$0xff] %vm139_vm0, %v487_v0  ;;  %147 = vst.msk [vmem:[#allocation2 + $0x38] sm:$0xff] %vm139_vm0, %v487_v0 }
  0x36   : > { %148 = vst.msk [vmem:[#allocation2 + $0x40] sm:$0xff] %vm139_vm0, %v487_v0  ;;  %s596_s15 = scalar_lea.vmem %s617_s1, %s358_s9 }
  0x37 LB: >> { %s353_s23 = sshll.u32 %s482_s22, 4  ;;  %s159_s24 = smul.u32 18, %s482_s22  ;;  %vm161_vm1 = vcmask 130048   ;;  %s482_s22 = sphi %s480_s22, %s154_s22  }
  0x38   : >> { %s156_s25 = scalar_lea.vmem %s114_s19, %s353_s23 [#allocation4]  ;;  %s154_s22 = sadd.s32 1, %s482_s22  }
  0x39   : >> { %v157_v1 = vld [vmem:[%s156_s25] sm:$0xff]  ;;  %v158_v2 = vld [vmem:[%s156_s25 + $0x8] sm:$0xff]  ;;  %s160_s26 = scalar_lea.vmem [#allocation2], %s159_s24  ;;  %p151_p7 = scmp.ge.s32.totalorder %s154_s22, 4  }
  0x3a   : >> { %162 = vst.msk [vmem:[%s160_s26] sm:$0xff] %vm161_vm1, %v157_v1  ;;  %163 = vst.msk [vmem:[%s160_s26 + $0x8] sm:$0xff] %vm161_vm1, %v158_v2  ;;  %vm219_vm2 = vcmask (%p151_p7), 195584   ;;  %vm222_vm3 = vcmask (%p151_p7), 189440   ;;  %vm263_vm4 = vcmask (%p151_p7), 48128  }
  0x3b   : > { %153 = sbr.rel (!%p151_p7) target bundleno = 55 (0x37), region = 83 }
  0x41   : > { %v164_v3 = vld [vmem:[#allocation2] ss:$3 sm:$0xff] (%p151_p7)  ;;  %v170_v4 = vld [vmem:[#allocation2 + $0x1] ss:$3 sm:$0xff] (%p151_p7)  ;;  %v179_v5 = vld [vmem:[#allocation2 + $0x2] ss:$3 sm:$0xff] (%p151_p7) }
  0x42   : > { %v175_v6 = vmax.f32 %v164_v3, %v170_v4  ;;  %v166_v7 = vld [vmem:[#allocation2 + $0x18] ss:$3 sm:$0xff]  ;;  %v172_v8 = vld [vmem:[#allocation2 + $0x19] ss:$3 sm:$0xff]  ;;  %v181_v10 = vld [vmem:[#allocation2 + $0x1a] ss:$3 sm:$0xff] }
  0x43   : > { %v176_v9 = vmax.f32 %v166_v7, %v172_v8  ;;  %v168_v11 = vld [vmem:[#allocation2 + $0x30] ss:$3 sm:$0xff]  ;;  %v174_v12 = vld [vmem:[#allocation2 + $0x31] ss:$3 sm:$0xff]  ;;  %v183_v16 = vld [vmem:[#allocation2 + $0x32] ss:$3 sm:$0xff] }
  0x44   : > { %v184_v13 = vmax.f32 %v175_v6, %v179_v5  ;;  %v177_v15 = vmax.f32 %v168_v11, %v174_v12 }
  0x45   : > { %v185_v14 = vmax.f32 %v176_v9, %v181_v10 }
  0x46   : > { %187 = vxpose.xlu0.b32.start [1/3] (short) (narrow) %v184_v13, 24  ;;  %v186_v17 = vmax.f32 %v177_v15, %v183_v16 }
  0x4a   : > { %188 = vxpose.xlu0.b32.cont [2/3] (short) (narrow) %v185_v14, 24 }
  0x4e   : > { %189 = vxpose.xlu0.b32.end [3/3] (short) (narrow) %v186_v17, 24 }
  0xc6   : > { %v203_v18 = vpop.trf.xlu0 }
  0xc7   : > { %220 = vst.msk [vmem:[#allocation3] sm:$0xff] %vm219_vm2, %v203_v18 }
  0xca   : > { %v204_v19 = vpop.trf.xlu0 }
  0xcb   : > { %221 = vst.msk [vmem:[#allocation3 + $0x8] sm:$0xff] %vm219_vm2, %v204_v19 }
  0xce   : > { %v205_v20 = vpop.trf.xlu0 }
  0xcf   : > { %223 = vst.msk [vmem:[#allocation3 + $0x10] sm:$0x3] %vm222_vm3, %v205_v20 }
  0xd2   : > { %v224_v21 = vld [vmem:[#allocation3] ss:$3 sm:$0x3f] }
  0xd6   : > { %v226_v22 = vld [vmem:[#allocation3 + $0x1] ss:$3 sm:$0x3f]  ;;  %v229_v24 = vld [vmem:[#allocation3 + $0x2] ss:$3 sm:$0x3f] }
  0xd7   : > { %v227_v23 = vmax.f32 %v224_v21, %v226_v22 }
  0xd9   : > { %v230_v25 = vmax.f32 %v227_v23, %v229_v24 }
  0xdb   : > { %231 = vxpose.xlu1.b32.start.end [1/1] (short) (narrow) %v230_v25, 24 }
 0x15b   : > { %v247_v26 = vpop.trf.xlu1 }
 0x15c   : > { %264 = vst.msk [vmem:[%s596_s15] sm:$0xff] %vm263_vm4, %v247_v26 }
 0x15f   : > { %v248_v27 = vpop.trf.xlu1 }
 0x160   : > { %265 = vst.msk [vmem:[%s596_s15 + $0x8] sm:$0xff] %vm263_vm4, %v248_v27 }
 0x163   : > { %v249_v28 = vpop.trf.xlu1 }
 0x164   : > { %266 = vst.msk [vmem:[%s596_s15 + $0x10] sm:$0xff] %vm263_vm4, %v249_v28 }
 0x165 PF: > { %p11_p9 = scmp.ge.s32.totalorder %s520_s11, 4   ;;  %s621_s6 = smov %s470_s7 }
 0x166   : > { %s622_s7 = smov %s474_s8  ;;  %s623_s8 = smov %s530_s14 }
 0x167   : > { %s624_s9 = smov %s520_s11  ;;  %13 = sbr.rel (!%p11_p9) target bundleno = 3 (0x3), region = 94 }
 0x16e   :  { %288 = vsyncpa [#allocation5], 1 }
 0x16f   :  { %290 = vsyncpa [#allocation5 + $0x1], 1 }

</bundles_post_ra>
